<compile_context>
chip_gen: v6e
topology: v6e:2x2x1
jax: 0.10.0
libtpu: 0.0.40
codegen_flags: <defaults>
</compile_context>

<pallas_src>
import jax
import jax.numpy as jnp
from jax.experimental import pallas as pl
from jax.experimental.pallas import tpu as pltpu


def _apply_mask_kernel(x_ref, m_ref, o_ref):
    """Elementwise hot path: the mask broadcasts over the time dimension.

    Works for both layouts:
      seq-major  : x (t_tile, B*H)   * m (1, B*H)
      batch_first: x (B, t_tile, H)  * m (B, 1, H)
    """
    o_ref[...] = (x_ref[...] * m_ref[...]).astype(o_ref.dtype)


def _make_locked_mask(key, x_shape, dtype, dropout, batch_first):
    """Bernoulli keep-mask, sampled once per (B, H), scaled by 1/(1-p)."""
    keep_prob = 1.0 - float(dropout)
    if batch_first:
        B, _, H = x_shape
        shape = (B, 1, H)
    else:
        _, B, H = x_shape
        shape = (1, B, H)
    keep = jax.random.bernoulli(key, keep_prob, shape)
    return (keep.astype(jnp.float32) / keep_prob).astype(dtype)


def _choose_time_tile(T, row_bytes, target_block_bytes):
    """Largest sublane-aligned (multiple-of-8) time tile within a byte budget."""
    if T <= 8:
        return T
    t = min(T, max(8, target_block_bytes // max(row_bytes, 1)))
    t = max(8, (t // 8) * 8)
    return min(t, T)


def locked_dropout(x, key, *, dropout=0.5, batch_first=False, training=True,
                   t_tile=None, target_block_bytes=4 << 20):
    """JAX/Pallas equivalent of LockedDropout(dropout, batch_first).forward(x)."""
    if (not training) or dropout == 0.0:
        return x
    if float(dropout) >= 1.0:
        # keep_prob == 0: every element is dropped.
        return jnp.zeros_like(x)

    mask = _make_locked_mask(key, x.shape, x.dtype, dropout, batch_first)
    itemsize = jnp.dtype(x.dtype).itemsize

    if batch_first:
        B, T, H = x.shape
        row_bytes = B * H * itemsize
        tt = t_tile if t_tile is not None else _choose_time_tile(
            T, row_bytes, target_block_bytes)
        grid = (pl.cdiv(T, tt),)
        in_specs = [
            pl.BlockSpec((B, tt, H), lambda t: (0, t, 0)),
            pl.BlockSpec((B, 1, H), lambda t: (0, 0, 0)),
        ]
        out_specs = pl.BlockSpec((B, tt, H), lambda t: (0, t, 0))
        x_in, m_in = x, mask
        out_shape = jax.ShapeDtypeStruct((B, T, H), x.dtype)
    else:
        T, B, H = x.shape
        BH = B * H
        row_bytes = BH * itemsize
        tt = t_tile if t_tile is not None else _choose_time_tile(
            T, row_bytes, target_block_bytes)
        grid = (pl.cdiv(T, tt),)
        in_specs = [
            pl.BlockSpec((tt, BH), lambda t: (t, 0)),
            pl.BlockSpec((1, BH), lambda t: (0, 0)),
        ]
        out_specs = pl.BlockSpec((tt, BH), lambda t: (t, 0))
        x_in = x.reshape(T, BH)          # row-major view, no HBM copy
        m_in = mask.reshape(1, BH)
        out_shape = jax.ShapeDtypeStruct((T, BH), x.dtype)

    # VMEM budget: 1 input + 1 output block, double-buffered (4 live blocks),
    # plus slack for the (tiny) mask block.  Capped to stay safe on v7x's
    # 64 MiB physical VMEM; the 32 MiB floor lifts v5e's 16 MiB scoped default.
    block_bytes = tt * row_bytes
    vmem_limit = int(min(48 << 20, max(32 << 20, 4 * block_bytes + (4 << 20))))

    out = pl.pallas_call(
        _apply_mask_kernel,
        out_shape=out_shape,
        grid=grid,
        in_specs=in_specs,
        out_specs=out_specs,
        compiler_params=pltpu.CompilerParams(
            # No cross-step state -> safe to shard the time-tile grid across
            # both TensorCores on v7x (neutral on v5e/v6e).
            dimension_semantics=("parallel",),
            vmem_limit_bytes=vmem_limit,
        ),
    )(x_in, m_in)

    return out if batch_first else out.reshape(T, B, H)


if __name__ == "__main__":
    root = jax.random.PRNGKey(0)
    k_x, k_m, k_x2, k_m2 = jax.random.split(root, 4)

    dropout = 0.25
    scale = 1.0 / (1.0 - dropout)

    # --- seq-major (batch_first=False): x is (T, B, H) ----------------------
    T, B, H = 16, 4, 128
    x = jax.random.normal(k_x, (T, B, H), dtype=jnp.float32)
    out = locked_dropout(x, k_m, dropout=dropout, batch_first=False,
                         training=True)
    out = jax.block_until_ready(out)

    ref_mask = _make_locked_mask(k_m, x.shape, x.dtype, dropout,
                                 batch_first=False)
    ref = x * ref_mask
    assert out.shape == x.shape
    assert bool(jnp.allclose(out, ref, atol=1e-6)), "seq-major mismatch"
    # Every element is either dropped (0) or scaled by exactly 1/(1-p).
    ok = jnp.isclose(out, 0.0, atol=1e-6) | jnp.isclose(out, x * scale,
                                                        rtol=1e-5, atol=1e-6)
    assert bool(jnp.all(ok)), "output values not in {0, x/(1-p)}"

    # --- batch_first=True: x is (B, T, H), no wrapper transpose -------------
    B2, T2, H2 = 2, 8, 64
    x2 = jax.random.normal(k_x2, (B2, T2, H2), dtype=jnp.float32)
    out2 = locked_dropout(x2, k_m2, dropout=dropout, batch_first=True,
                          training=True)
    out2 = jax.block_until_ready(out2)

    ref_mask2 = _make_locked_mask(k_m2, x2.shape, x2.dtype, dropout,
                                  batch_first=True)
    ref2 = x2 * ref_mask2
    assert out2.shape == x2.shape
    assert bool(jnp.allclose(out2, ref2, atol=1e-6)), "batch_first mismatch"

    # --- eval mode / dropout=0 are identity, dropout>=1 zeros ---------------
    out_eval = locked_dropout(x, k_m, dropout=dropout, training=False)
    assert bool(jnp.all(out_eval == x))
    out_nodrop = locked_dropout(x, k_m, dropout=0.0, training=True)
    assert bool(jnp.all(out_nodrop == x))
    out_full = jax.block_until_ready(
        locked_dropout(x, k_m, dropout=1.0, training=True))
    assert bool(jnp.all(out_full == 0.0))

    print("KERNEL_OK")
</pallas_src>

<mosaic_0001>
module attributes {stable_mosaic.version = 11 : i64} {
  func.func @_apply_mask_kernel(%arg0: i32, %arg1: memref<16x512xf32, #tpu.memory_space<vmem>>, %arg2: memref<1x512xf32, #tpu.memory_space<vmem>>, %arg3: memref<16x512xf32, #tpu.memory_space<vmem>>) attributes {dimension_semantics = [#tpu.dimension_semantics<parallel>], iteration_bounds = array<i64: 1>, scalar_prefetch = 0 : i64, scratch_operands = 0 : i64, tpu.core_type = #tpu.core_type<tc>, window_params = [{transform_indices = @transform_0, window_bounds = array<i64: 16, 512>}, {pipeline_mode = #tpu.pipeline_mode<synchronous>, transform_indices = @transform_1, window_bounds = array<i64: 1, 512>}, {transform_indices = @transform_2, window_bounds = array<i64: 16, 512>}]} {
    %c0 = arith.constant 0 : index
    %c0_0 = arith.constant 0 : index
    %0 = vector.load %arg1[%c0, %c0_0] : memref<16x512xf32, #tpu.memory_space<vmem>>, vector<16x512xf32>
    %c0_1 = arith.constant 0 : index
    %c0_2 = arith.constant 0 : index
    %1 = vector.load %arg2[%c0_1, %c0_2] : memref<1x512xf32, #tpu.memory_space<vmem>>, vector<1x512xf32>
    %2 = vector.broadcast %1 : vector<1x512xf32> to vector<16x512xf32>
    %3 = arith.mulf %0, %2 : vector<16x512xf32>
    %c0_3 = arith.constant 0 : index
    %c0_4 = arith.constant 0 : index
    %4 = vector.load %arg3[%c0_3, %c0_4] : memref<16x512xf32, #tpu.memory_space<vmem>>, vector<16x512xf32>
    tpu.vector_store %arg3[%c0_3, %c0_4], %3 {strides = array<i32>} : memref<16x512xf32, #tpu.memory_space<vmem>>, vector<16x512xf32>,
    return
  }
  func.func @transform_0(%arg0: i32) -> (i32, i32) {
    %c0_i32 = arith.constant 0 : i32
    %c0_i32_0 = arith.constant 0 : i32
    return %arg0, %c0_i32 : i32, i32
  }
  func.func @transform_1(%arg0: i32) -> (i32, i32) {
    %c0_i32 = arith.constant 0 : i32
    %c0_i32_0 = arith.constant 0 : i32
    %c0_i32_1 = arith.constant 0 : i32
    return %c0_i32, %c0_i32_0 : i32, i32
  }
  func.func @transform_2(%arg0: i32) -> (i32, i32) {
    %c0_i32 = arith.constant 0 : i32
    %c0_i32_0 = arith.constant 0 : i32
    return %arg0, %c0_i32 : i32, i32
  }
}

</mosaic_0001>

<bundles_post_ra>
// kernel: tpu_custom_call.1
= control target key start
LH: loop header
LB: loop body
LE: loop exit
PB: predicated region body
PF: predicated region fallthrough
CT: control target
= control target key end

     0   :  { %7 = vsyncpa [#allocation3], 0  ;;  %s208_s0 = inlined_call_operand.hbm [shape: f32[16,512], index: 0, kind: input, shape index: {}]   ;;  %s209_s1 = inlined_call_operand.hbm [shape: f32[1,512], index: 1, kind: input, shape index: {}]   ;;  %s210_s2 = inlined_call_operand.hbm [shape: f32[16,512], index: 2, kind: output, shape index: {}]  }
   0x1   :  { %8 = vsyncpa [#allocation6], 0 }
   0x2   :  { %9 = vsyncpa [#allocation4], 0  ;;  %s173_s9 = smov [#allocation2]  }
   0x3   :  { %s15_s10 = sshll.u32 %s173_s9, 4  ;;  %s16_s10 = int_to_ptr.vmem [resolvable:$true] %s15_s10 }
   0x4   :  { %s115_s11 = scalar_lea.vmem %s16_s10, 1024  ;;  %p120_p1 = scmp.lt.s32.totalorder %s16_s10, %s16_s10 }
   0x5   :  { %p116_p0 = scmp.ne.s32.totalorder %s16_s10, %s115_s11  ;;  %p121_p2 = scmp.lt.s32.totalorder %s115_s11, %s115_s11 }
   0x7   :  { %p122_p3 = por %p121_p2, %p120_p1 }
   0x9   :  { %p123_p4 = pnand %p122_p3, %p116_p0 }
   0xb   :  { %126 = shalt.err (!%p123_p4)
}
   0xc   :  { %s174_s12 = smov 512   ;;  %s175_s13 = smov 32  }
   0xd   :  { %21 = dma.hbm_to_vmem [thread:$0]  %s208_s0, 1024, %s16_s10, [#allocation3], %s174_s12, %s174_s12, %s175_s13  }
   0xe   :  { %s176_s16 = smov [#allocation5]  }
   0xf   :  { %s28_s17 = sshll.u32 %s176_s16, 4  ;;  %s29_s17 = int_to_ptr.vmem [resolvable:$true] %s28_s17 }
  0x10   :  { %s135_s18 = scalar_lea.vmem %s29_s17, 64  ;;  %p140_p6 = scmp.lt.s32.totalorder %s29_s17, %s29_s17 }
  0x11   :  { %p136_p5 = scmp.ne.s32.totalorder %s29_s17, %s135_s18  ;;  %p141_p7 = scmp.lt.s32.totalorder %s135_s18, %s135_s18 }
  0x13   :  { %p142_p8 = por %p141_p7, %p140_p6 }
  0x15   :  { %p143_p9 = pnand %p142_p8, %p136_p5 }
  0x17   :  { %146 = shalt.err (!%p143_p9)
}
  0x18   :  { %31 = dma.hbm_to_vmem [thread:$0]  %s209_s1, 64, %s29_s17, [#allocation6]  }
  0x19   :  { %167 = dma.done.wait [#allocation3], 1024  }
  0x1a   :  { %168 = vsyncadd [#allocation3], 4294966272 }
  0x1b   :  { %169 = dma.done.wait [#allocation6], 64  }
  0x1c   :  { %170 = vsyncadd [#allocation6], 4294967232  ;;  %v48_v0 = vlaneseq  ;;  %v38_v6 = vld [vmem:[#allocation2] sm:$0xff]  ;;  %v39_v8 = vld [vmem:[#allocation2 + $0x8] sm:$0xff]  ;;  %s177_s0 = smov [#allocation7]  }
  0x1d   :  { %v46_v7 = vld [vmem:[#allocation5] sm:$0xf]  ;;  %v40_v11 = vld [vmem:[#allocation2 + $0x10] sm:$0xff]  ;;  %v41_v13 = vld [vmem:[#allocation2 + $0x18] sm:$0xff]  ;;  %s89_s1 = sshll.u32 %s177_s0, 4  ;;  %s90_s1 = int_to_ptr.vmem [resolvable:$true] %s89_s1 }
  0x1e   :  { %v49_v1 = vshrl.u32 %v48_v0, 7  ;;  %v42_v15 = vld [vmem:[#allocation2 + $0x20] sm:$0xff]  ;;  %v43_v16 = vld [vmem:[#allocation2 + $0x28] sm:$0xff]  ;;  %v44_v17 = vld [vmem:[#allocation2 + $0x30] sm:$0xff]  ;;  %s147_s21 = scalar_lea.vmem %s90_s1, 1024  ;;  %p152_p11 = scmp.lt.s32.totalorder %s90_s1, %s90_s1 }
  0x1f   :  { %v45_v18 = vld [vmem:[#allocation2 + $0x38] sm:$0xff]  ;;  %p148_p10 = scmp.ne.s32.totalorder %s90_s1, %s147_s21  ;;  %p153_p12 = scmp.lt.s32.totalorder %s147_s21, %s147_s21 }
  0x20   :  { %v50_v2 = vsub.s32 0, %v49_v1  ;;  %v54_v3 = vsub.s32 1, %v49_v1  ;;  %v58_v4 = vsub.s32 2, %v49_v1  ;;  %v62_v5 = vsub.s32 3, %v49_v1 }
  0x21   :  { %p154_p13 = por %p153_p12, %p152_p11 }
  0x22   :  { %v51_v9 = vrot.slane %v46_v7, %v50_v2  ;;  %v55_v10 = vrot.slane %v46_v7, %v54_v3  ;;  %v59_v12 = vrot.slane %v46_v7, %v58_v4  ;;  %v63_v14 = vrot.slane %v46_v7, %v62_v5 }
  0x23   :  { %p155_p0 = pnand %p154_p13, %p148_p10 }
  0x24   :  { %v68_v19 = vmul.f32 %v51_v9, %v38_v6  ;;  %v69_v20 = vmul.f32 %v55_v10, %v39_v8  ;;  %v70_v21 = vmul.f32 %v59_v12, %v40_v11  ;;  %v71_v22 = vmul.f32 %v63_v14, %v41_v13 }
  0x25   :  { %v72_v23 = vmul.f32 %v51_v9, %v42_v15  ;;  %v73_v24 = vmul.f32 %v55_v10, %v43_v16  ;;  %v74_v25 = vmul.f32 %v59_v12, %v44_v17  ;;  %v75_v26 = vmul.f32 %v63_v14, %v45_v18 }
  0x26   :  { %76 = vst [vmem:[#allocation7] sm:$0xff] %v68_v19  ;;  %77 = vst [vmem:[#allocation7 + $0x8] sm:$0xff] %v69_v20 }
  0x27   :  { %78 = vst [vmem:[#allocation7 + $0x10] sm:$0xff] %v70_v21  ;;  %79 = vst [vmem:[#allocation7 + $0x18] sm:$0xff] %v71_v22 }
  0x28   :  { %80 = vst [vmem:[#allocation7 + $0x20] sm:$0xff] %v72_v23  ;;  %81 = vst [vmem:[#allocation7 + $0x28] sm:$0xff] %v73_v24 }
  0x29   :  { %82 = vst [vmem:[#allocation7 + $0x30] sm:$0xff] %v74_v25  ;;  %83 = vst [vmem:[#allocation7 + $0x38] sm:$0xff] %v75_v26 }
  0x2a   :  { %158 = shalt.err (!%p155_p0)
}
  0x2b   :  { %95 = dma.vmem_to_hbm [thread:$0]  %s90_s1, 1024, %s210_s2, [#allocation4], %s174_s12, %s174_s12, %s175_s13  }
  0x2c   :  { %171 = dma.done.wait [#allocation4], 1024  }
  0x2d   :  { %172 = vsyncadd [#allocation4], 4294966272 }
  0x2e   :  { %99 = vsyncpa [#allocation3], 1 }
  0x2f   :  { %100 = vsyncpa [#allocation6], 1 }
  0x30   :  { %101 = vsyncpa [#allocation4], 1 }

</bundles_post_ra>
